<compile_context>
chip_gen: v6e
topology: v6e:2x2x1
jax: 0.10.0
libtpu: 0.0.40
codegen_flags: <defaults>
</compile_context>

<pallas_src>
import jax
import jax.numpy as jnp
from jax.experimental import pallas as pl
from jax.experimental.pallas import tpu as pltpu

H1 = 400     # first hidden width (per head)
H1P = 512    # lane-aligned padded width per head
H2 = 300     # second hidden width


def _critic_kernel(xu_ref,
                   w1_ref, w2_ref, b2_ref,
                   w4_ref, w5_ref, b5_ref,
                   w3_ref, w6_ref, b36_ref,
                   out_ref):
    xu = xu_ref[...]                                        # (TB, S+A+1) bf16

    # ---- Head 1, end-to-end (bias folded into the layer-1 weight) ----------
    h = jnp.dot(xu, w1_ref[...], preferred_element_type=jnp.float32)  # (TB, H1P)
    h = jnp.maximum(h, 0.0).astype(jnp.bfloat16)            # fused ReLU + cast
    h2 = jnp.maximum(
        jnp.dot(h, w2_ref[...], preferred_element_type=jnp.float32) + b2_ref[...],
        0.0)                                                # (TB, H2) f32
    # H2 -> 1 on VPU multiply + XLU lane reduce (kept off the MXU).
    q1 = jnp.sum(h2 * w3_ref[...], axis=-1, keepdims=True)  # (TB, 1)

    # ---- Head 2, end-to-end -------------------------------------------------
    g = jnp.dot(xu, w4_ref[...], preferred_element_type=jnp.float32)
    g = jnp.maximum(g, 0.0).astype(jnp.bfloat16)
    g2 = jnp.maximum(
        jnp.dot(g, w5_ref[...], preferred_element_type=jnp.float32) + b5_ref[...],
        0.0)
    q2 = jnp.sum(g2 * w6_ref[...], axis=-1, keepdims=True)  # (TB, 1)

    # Lane-dense (TB, 2) output: q1 in lane 0, q2 in lane 1, b3/b6 folded in.
    out_ref[:, 0:1] = q1 + b36_ref[:, 0:1]
    out_ref[:, 1:2] = q2 + b36_ref[:, 1:2]


def init_critic_params(key, state_dim, action_dim):
    """PyTorch-equivalent params: W as (in, out), b as (1, out), f32.
    nn.Linear default init: uniform(-1/sqrt(fan_in), 1/sqrt(fan_in))."""
    in_dim = state_dim + action_dim
    dims = [(in_dim, H1), (H1, H2), (H2, 1),   # l1, l2, l3
            (in_dim, H1), (H1, H2), (H2, 1)]   # l4, l5, l6
    params = {}
    for idx, (fan_in, fan_out) in enumerate(dims, start=1):
        key, kw, kb = jax.random.split(key, 3)
        bound = 1.0 / jnp.sqrt(jnp.float32(fan_in))
        params[f"w{idx}"] = jax.random.uniform(
            kw, (fan_in, fan_out), jnp.float32, -bound, bound)
        params[f"b{idx}"] = jax.random.uniform(
            kb, (1, fan_out), jnp.float32, -bound, bound)
    return params


def pack_critic_params(params):
    """One-time repack into the kernel's fused / lane-padded / bf16 layout."""
    in_dim = params["w1"].shape[0]
    kp = in_dim + 1                      # +1 row for the folded layer-1 bias

    def pack_l1(w, b):
        # (S+A+1, H1P): columns [H1:H1P] are zero, last row carries the bias.
        wp = jnp.zeros((kp, H1P), jnp.float32)
        wp = wp.at[:in_dim, :H1].set(w)
        wp = wp.at[in_dim, :H1].set(b.reshape(-1))
        return wp.astype(jnp.bfloat16)

    def pack_l2(w):
        # (H1P, H2): rows [H1:H1P] are zero (matching the zero padded lanes).
        return jnp.zeros((H1P, H2), jnp.float32).at[:H1].set(w).astype(jnp.bfloat16)

    return {
        "w1": pack_l1(params["w1"], params["b1"]),   # (S+A+1, H1P) bf16
        "w4": pack_l1(params["w4"], params["b4"]),   # (S+A+1, H1P) bf16
        "w2": pack_l2(params["w2"]),                 # (H1P, H2) bf16
        "b2": params["b2"],                          # (1, H2) f32
        "w5": pack_l2(params["w5"]),                 # (H1P, H2) bf16
        "b5": params["b5"],                          # (1, H2) f32
        "w3": params["w3"].reshape(1, H2),           # (1, H2) f32 row
        "w6": params["w6"].reshape(1, H2),           # (1, H2) f32 row
        "b36": jnp.concatenate([params["b3"].reshape(1, 1),
                                params["b6"].reshape(1, 1)], axis=1),  # (1, 2)
    }


def _tile_and_pad(batch):
    # Tile capped at 256 rows: >= 2 grid steps for v7x's two TensorCores at
    # batch >= 512, full 256-row MXU M tiles on v6e/v7x, and a small per-head
    # f32 intermediate (helps v5e's single vector-store slot most).
    if batch >= 256:
        tb = 256
    else:
        tb = max(16, ((batch + 15) // 16) * 16)
    padded = ((batch + tb - 1) // tb) * tb
    return tb, padded


@jax.jit
def critic_forward(x, u, packed):
    """Equivalent of Critic.forward(x, u) -> (q1, q2)."""
    batch, state_dim = x.shape
    action_dim = u.shape[1]
    kp = state_dim + action_dim + 1
    tb, padded_b = _tile_and_pad(batch)

    # Single fused layer-1 operand: (x | u | 1); the trailing constant-1 lane
    # picks up the bias row of the packed layer-1 weights.
    ones = jnp.ones((batch, 1), x.dtype)
    xu1 = jnp.concatenate([x, u, ones], axis=1).astype(jnp.bfloat16)
    if padded_b != batch:
        xu1 = jnp.pad(xu1, ((0, padded_b - batch), (0, 0)))

    def _tile_map(i):
        return (i, 0)

    def _const_map(i):
        return (0, 0)

    in_specs = [
        pl.BlockSpec((tb, kp), _tile_map),            # xu1
        pl.BlockSpec((kp, H1P), _const_map),          # w1 (bias folded)
        pl.BlockSpec((H1P, H2), _const_map),          # w2
        pl.BlockSpec((1, H2), _const_map),            # b2
        pl.BlockSpec((kp, H1P), _const_map),          # w4 (bias folded)
        pl.BlockSpec((H1P, H2), _const_map),          # w5
        pl.BlockSpec((1, H2), _const_map),            # b5
        pl.BlockSpec((1, H2), _const_map),            # w3 row
        pl.BlockSpec((1, H2), _const_map),            # w6 row
        pl.BlockSpec((1, 2), _const_map),             # b36
    ]
    out_specs = pl.BlockSpec((tb, 2), _tile_map)

    out = pl.pallas_call(
        _critic_kernel,
        out_shape=jax.ShapeDtypeStruct((padded_b, 2), jnp.float32),
        grid=(padded_b // tb,),
        in_specs=in_specs,
        out_specs=out_specs,
        compiler_params=pltpu.CompilerParams(
            dimension_semantics=("parallel",)),
    )(xu1,
      packed["w1"], packed["w2"], packed["b2"],
      packed["w4"], packed["w5"], packed["b5"],
      packed["w3"], packed["w6"], packed["b36"])

    # Padded rows hold bias-only garbage; always slice before use.
    q1 = out[:batch, 0:1]
    q2 = out[:batch, 1:2]
    return q1, q2


if __name__ == "__main__":
    state_dim, action_dim, batch = 8, 4, 2

    key = jax.random.PRNGKey(0)
    kx, ku, kp = jax.random.split(key, 3)

    x = jax.random.normal(kx, (batch, state_dim), jnp.float32)
    u = jax.random.normal(ku, (batch, action_dim), jnp.float32)
    params = init_critic_params(kp, state_dim, action_dim)
    packed = pack_critic_params(params)

    q1, q2 = critic_forward(x, u, packed)
    jax.block_until_ready((q1, q2))

    # Pure-JAX f32 reference of the same math (original, unfused layout).
    xu = jnp.concatenate([x, u], axis=1)
    r1 = jnp.maximum(xu @ params["w1"] + params["b1"], 0.0)
    r1 = jnp.maximum(r1 @ params["w2"] + params["b2"], 0.0)
    r1 = r1 @ params["w3"] + params["b3"]
    r2 = jnp.maximum(xu @ params["w4"] + params["b4"], 0.0)
    r2 = jnp.maximum(r2 @ params["w5"] + params["b5"], 0.0)
    r2 = r2 @ params["w6"] + params["b6"]

    assert q1.shape == (batch, 1) and q2.shape == (batch, 1)
    # bf16 matmuls (f32 accumulation) -> loosened tolerance vs f32 reference.
    assert jnp.allclose(q1, r1, atol=3e-2, rtol=3e-2)
    assert jnp.allclose(q2, r2, atol=3e-2, rtol=3e-2)

    print("KERNEL_OK")
</pallas_src>

<mosaic_0001>
module attributes {stable_mosaic.version = 11 : i64} {
  func.func @_critic_kernel(%arg0: i32, %arg1: memref<16x13xbf16, #tpu.memory_space<vmem>>, %arg2: memref<13x512xbf16, #tpu.memory_space<vmem>>, %arg3: memref<512x300xbf16, #tpu.memory_space<vmem>>, %arg4: memref<1x300xf32, #tpu.memory_space<vmem>>, %arg5: memref<13x512xbf16, #tpu.memory_space<vmem>>, %arg6: memref<512x300xbf16, #tpu.memory_space<vmem>>, %arg7: memref<1x300xf32, #tpu.memory_space<vmem>>, %arg8: memref<1x300xf32, #tpu.memory_space<vmem>>, %arg9: memref<1x300xf32, #tpu.memory_space<vmem>>, %arg10: memref<1x2xf32, #tpu.memory_space<vmem>>, %arg11: memref<16x2xf32, #tpu.memory_space<vmem>>) attributes {dimension_semantics = [#tpu.dimension_semantics<parallel>], iteration_bounds = array<i64: 1>, scalar_prefetch = 0 : i64, scratch_operands = 0 : i64, tpu.core_type = #tpu.core_type<tc>, window_params = [{transform_indices = @transform_0, window_bounds = array<i64: 16, 13>}, {pipeline_mode = #tpu.pipeline_mode<synchronous>, transform_indices = @transform_1, window_bounds = array<i64: 13, 512>}, {pipeline_mode = #tpu.pipeline_mode<synchronous>, transform_indices = @transform_2, window_bounds = array<i64: 512, 300>}, {pipeline_mode = #tpu.pipeline_mode<synchronous>, transform_indices = @transform_3, window_bounds = array<i64: 1, 300>}, {pipeline_mode = #tpu.pipeline_mode<synchronous>, transform_indices = @transform_4, window_bounds = array<i64: 13, 512>}, {pipeline_mode = #tpu.pipeline_mode<synchronous>, transform_indices = @transform_5, window_bounds = array<i64: 512, 300>}, {pipeline_mode = #tpu.pipeline_mode<synchronous>, transform_indices = @transform_6, window_bounds = array<i64: 1, 300>}, {pipeline_mode = #tpu.pipeline_mode<synchronous>, transform_indices = @transform_7, window_bounds = array<i64: 1, 300>}, {pipeline_mode = #tpu.pipeline_mode<synchronous>, transform_indices = @transform_8, window_bounds = array<i64: 1, 300>}, {pipeline_mode = #tpu.pipeline_mode<synchronous>, transform_indices = @transform_9, window_bounds = array<i64: 1, 2>}, {transform_indices = @transform_10, window_bounds = array<i64: 16, 2>}]} {
    %c0 = arith.constant 0 : index
    %c0_0 = arith.constant 0 : index
    %0 = vector.load %arg1[%c0, %c0_0] : memref<16x13xbf16, #tpu.memory_space<vmem>>, vector<16x13xbf16>
    %c0_1 = arith.constant 0 : index
    %c0_2 = arith.constant 0 : index
    %1 = vector.load %arg2[%c0_1, %c0_2] : memref<13x512xbf16, #tpu.memory_space<vmem>>, vector<13x512xbf16>
    %cst = arith.constant dense<0.000000e+00> : vector<16x512xf32>
    %2 = tpu.matmul %0, %1, %cst {dimension_numbers = #tpu.dot_dimension_numbers<[1], [0], [0], [1], [0, 0, 1, 1], [], []>} : vector<16x13xbf16>, vector<13x512xbf16>, vector<16x512xf32> -> vector<16x512xf32>
    %cst_3 = arith.constant 0.000000e+00 : f32
    %3 = vector.broadcast %cst_3 : f32 to vector<16x512xf32>
    %4 = arith.maximumf %2, %3 : vector<16x512xf32>
    %5 = arith.truncf %4 : vector<16x512xf32> to vector<16x512xbf16>
    %c0_4 = arith.constant 0 : index
    %c0_5 = arith.constant 0 : index
    %6 = vector.load %arg3[%c0_4, %c0_5] : memref<512x300xbf16, #tpu.memory_space<vmem>>, vector<512x300xbf16>
    %cst_6 = arith.constant dense<0.000000e+00> : vector<16x300xf32>
    %7 = tpu.matmul %5, %6, %cst_6 {dimension_numbers = #tpu.dot_dimension_numbers<[1], [0], [0], [1], [0, 0, 1, 1], [], []>} : vector<16x512xbf16>, vector<512x300xbf16>, vector<16x300xf32> -> vector<16x300xf32>
    %c0_7 = arith.constant 0 : index
    %c0_8 = arith.constant 0 : index
    %8 = vector.load %arg4[%c0_7, %c0_8] : memref<1x300xf32, #tpu.memory_space<vmem>>, vector<1x300xf32>
    %9 = vector.broadcast %8 : vector<1x300xf32> to vector<16x300xf32>
    %10 = arith.addf %7, %9 : vector<16x300xf32>
    %cst_9 = arith.constant 0.000000e+00 : f32
    %11 = vector.broadcast %cst_9 : f32 to vector<16x300xf32>
    %12 = arith.maximumf %10, %11 : vector<16x300xf32>
    %c0_10 = arith.constant 0 : index
    %c0_11 = arith.constant 0 : index
    %13 = vector.load %arg8[%c0_10, %c0_11] : memref<1x300xf32, #tpu.memory_space<vmem>>, vector<1x300xf32>
    %14 = vector.broadcast %13 : vector<1x300xf32> to vector<16x300xf32>
    %15 = arith.mulf %12, %14 : vector<16x300xf32>
    %cst_12 = arith.constant dense<0.000000e+00> : vector<16xf32>
    %16 = vector.multi_reduction <add>, %15, %cst_12 [1] : vector<16x300xf32> to vector<16xf32>
    %17 = vector.shape_cast %16 : vector<16xf32> to vector<16x1xf32>
    %c0_13 = arith.constant 0 : index
    %c0_14 = arith.constant 0 : index
    %18 = vector.load %arg5[%c0_13, %c0_14] : memref<13x512xbf16, #tpu.memory_space<vmem>>, vector<13x512xbf16>
    %cst_15 = arith.constant dense<0.000000e+00> : vector<16x512xf32>
    %19 = tpu.matmul %0, %18, %cst_15 {dimension_numbers = #tpu.dot_dimension_numbers<[1], [0], [0], [1], [0, 0, 1, 1], [], []>} : vector<16x13xbf16>, vector<13x512xbf16>, vector<16x512xf32> -> vector<16x512xf32>
    %cst_16 = arith.constant 0.000000e+00 : f32
    %20 = vector.broadcast %cst_16 : f32 to vector<16x512xf32>
    %21 = arith.maximumf %19, %20 : vector<16x512xf32>
    %22 = arith.truncf %21 : vector<16x512xf32> to vector<16x512xbf16>
    %c0_17 = arith.constant 0 : index
    %c0_18 = arith.constant 0 : index
    %23 = vector.load %arg6[%c0_17, %c0_18] : memref<512x300xbf16, #tpu.memory_space<vmem>>, vector<512x300xbf16>
    %cst_19 = arith.constant dense<0.000000e+00> : vector<16x300xf32>
    %24 = tpu.matmul %22, %23, %cst_19 {dimension_numbers = #tpu.dot_dimension_numbers<[1], [0], [0], [1], [0, 0, 1, 1], [], []>} : vector<16x512xbf16>, vector<512x300xbf16>, vector<16x300xf32> -> vector<16x300xf32>
    %c0_20 = arith.constant 0 : index
    %c0_21 = arith.constant 0 : index
    %25 = vector.load %arg7[%c0_20, %c0_21] : memref<1x300xf32, #tpu.memory_space<vmem>>, vector<1x300xf32>
    %26 = vector.broadcast %25 : vector<1x300xf32> to vector<16x300xf32>
    %27 = arith.addf %24, %26 : vector<16x300xf32>
    %cst_22 = arith.constant 0.000000e+00 : f32
    %28 = vector.broadcast %cst_22 : f32 to vector<16x300xf32>
    %29 = arith.maximumf %27, %28 : vector<16x300xf32>
    %c0_23 = arith.constant 0 : index
    %c0_24 = arith.constant 0 : index
    %30 = vector.load %arg9[%c0_23, %c0_24] : memref<1x300xf32, #tpu.memory_space<vmem>>, vector<1x300xf32>
    %31 = vector.broadcast %30 : vector<1x300xf32> to vector<16x300xf32>
    %32 = arith.mulf %29, %31 : vector<16x300xf32>
    %cst_25 = arith.constant dense<0.000000e+00> : vector<16xf32>
    %33 = vector.multi_reduction <add>, %32, %cst_25 [1] : vector<16x300xf32> to vector<16xf32>
    %34 = vector.shape_cast %33 : vector<16xf32> to vector<16x1xf32>
    %c0_26 = arith.constant 0 : index
    %c0_27 = arith.constant 0 : index
    %35 = vector.load %arg10[%c0_26, %c0_27] : memref<1x2xf32, #tpu.memory_space<vmem>>, vector<1x1xf32>
    %36 = vector.broadcast %35 : vector<1x1xf32> to vector<16x1xf32>
    %37 = arith.addf %17, %36 : vector<16x1xf32>
    %c0_28 = arith.constant 0 : index
    %c0_29 = arith.constant 0 : index
    %38 = vector.load %arg11[%c0_28, %c0_29] : memref<16x2xf32, #tpu.memory_space<vmem>>, vector<16x1xf32>
    tpu.vector_store %arg11[%c0_28, %c0_29], %37 {strides = array<i32>} : memref<16x2xf32, #tpu.memory_space<vmem>>, vector<16x1xf32>,
    %c0_30 = arith.constant 0 : index
    %c1 = arith.constant 1 : index
    %39 = vector.load %arg10[%c0_30, %c1] : memref<1x2xf32, #tpu.memory_space<vmem>>, vector<1x1xf32>
    %40 = vector.broadcast %39 : vector<1x1xf32> to vector<16x1xf32>
    %41 = arith.addf %34, %40 : vector<16x1xf32>
    %c0_31 = arith.constant 0 : index
    %c1_32 = arith.constant 1 : index
    %42 = vector.load %arg11[%c0_31, %c1_32] : memref<16x2xf32, #tpu.memory_space<vmem>>, vector<16x1xf32>
    tpu.vector_store %arg11[%c0_31, %c1_32], %41 {strides = array<i32>} : memref<16x2xf32, #tpu.memory_space<vmem>>, vector<16x1xf32>,
    return
  }
  func.func @transform_0(%arg0: i32) -> (i32, i32) {
    %c0_i32 = arith.constant 0 : i32
    %c0_i32_0 = arith.constant 0 : i32
    return %arg0, %c0_i32 : i32, i32
  }
  func.func @transform_1(%arg0: i32) -> (i32, i32) {
    %c0_i32 = arith.constant 0 : i32
    %c0_i32_0 = arith.constant 0 : i32
    %c0_i32_1 = arith.constant 0 : i32
    return %c0_i32, %c0_i32_0 : i32, i32
  }
  func.func @transform_2(%arg0: i32) -> (i32, i32) {
    %c0_i32 = arith.constant 0 : i32
    %c0_i32_0 = arith.constant 0 : i32
    %c0_i32_1 = arith.constant 0 : i32
    return %c0_i32, %c0_i32_0 : i32, i32
  }
  func.func @transform_3(%arg0: i32) -> (i32, i32) {
    %c0_i32 = arith.constant 0 : i32
    %c0_i32_0 = arith.constant 0 : i32
    %c0_i32_1 = arith.constant 0 : i32
    return %c0_i32, %c0_i32_0 : i32, i32
  }
  func.func @transform_4(%arg0: i32) -> (i32, i32) {
    %c0_i32 = arith.constant 0 : i32
    %c0_i32_0 = arith.constant 0 : i32
    %c0_i32_1 = arith.constant 0 : i32
    return %c0_i32, %c0_i32_0 : i32, i32
  }
  func.func @transform_5(%arg0: i32) -> (i32, i32) {
    %c0_i32 = arith.constant 0 : i32
    %c0_i32_0 = arith.constant 0 : i32
    %c0_i32_1 = arith.constant 0 : i32
    return %c0_i32, %c0_i32_0 : i32, i32
  }
  func.func @transform_6(%arg0: i32) -> (i32, i32) {
    %c0_i32 = arith.constant 0 : i32
    %c0_i32_0 = arith.constant 0 : i32
    %c0_i32_1 = arith.constant 0 : i32
    return %c0_i32, %c0_i32_0 : i32, i32
  }
  func.func @transform_7(%arg0: i32) -> (i32, i32) {
    %c0_i32 = arith.constant 0 : i32
    %c0_i32_0 = arith.constant 0 : i32
    %c0_i32_1 = arith.constant 0 : i32
    return %c0_i32, %c0_i32_0 : i32, i32
  }
  func.func @transform_8(%arg0: i32) -> (i32, i32) {
    %c0_i32 = arith.constant 0 : i32
    %c0_i32_0 = arith.constant 0 : i32
    %c0_i32_1 = arith.constant 0 : i32
    return %c0_i32, %c0_i32_0 : i32, i32
  }
  func.func @transform_9(%arg0: i32) -> (i32, i32) {
    %c0_i32 = arith.constant 0 : i32
    %c0_i32_0 = arith.constant 0 : i32
    %c0_i32_1 = arith.constant 0 : i32
    return %c0_i32, %c0_i32_0 : i32, i32
  }
  func.func @transform_10(%arg0: i32) -> (i32, i32) {
    %c0_i32 = arith.constant 0 : i32
    %c0_i32_0 = arith.constant 0 : i32
    return %arg0, %c0_i32 : i32, i32
  }
}

</mosaic_0001>

<bundles_post_ra>
// kernel: critic_forward.1
= control target key start
LH: loop header
LB: loop body
LE: loop exit
PB: predicated region body
PF: predicated region fallthrough
CT: control target
= control target key end

     0   :  { %vm67_vm0 = vcmask 1045504   ;;  %vm68_vm1 = vcmask 1046528   ;;  %v2634_v1 = vmov 0   ;;  %v2635_v2 = vmov 65535   ;;  %s3389_s1 = inlined_call_operand.vmem [shape: bf16[13,512], index: 1, kind: input, shape index: {}]   ;;  %s3390_s0 = inlined_call_operand.vmem [shape: bf16[16,13], index: 0, kind: input, shape index: {}]   ;;  %s3391_s2 = inlined_call_operand.vmem [shape: bf16[512,300], index: 2, kind: input, shape index: {}]   ;;  %s3392_s4 = inlined_call_operand.vmem [shape: bf16[13,512], index: 4, kind: input, shape index: {}]   ;;  %s3393_s5 = inlined_call_operand.vmem [shape: bf16[512,300], index: 5, kind: input, shape index: {}]   ;;  %s3394_s3 = inlined_call_operand.vmem [shape: f32[1,300], index: 3, kind: input, shape index: {}]   ;;  %s3395_s7 = inlined_call_operand.vmem [shape: f32[1,300], index: 7, kind: input, shape index: {}]   ;;  %s3396_s9 = inlined_call_operand.vmem [shape: f32[1,2], index: 9, kind: input, shape index: {}]   ;;  %s3397_s10 = inlined_call_operand.vmem [shape: f32[16,2], index: 10, kind: output, shape index: {}]   ;;  %s3398_s6 = inlined_call_operand.vmem [shape: f32[1,300], index: 6, kind: input, shape index: {}]   ;;  %s3399_s8 = inlined_call_operand.vmem [shape: f32[1,300], index: 8, kind: input, shape index: {}]  }
   0x1   :  { %v2365_v0 = vld [vmem:[%s3389_s1 + $0x4] ss:$16 sps:$4 sm:$0x7f]   ;;  %115 = vmatprep.mubr.bf16.mxu0 %v2634_v1  ;;  %158 = vmatprep.mubr.bf16.mxu1 %v2634_v1  ;;  %v69_v3 = vsel %vm67_vm0, 4294967295, %v2635_v2  ;;  %v2374_v13 = vld [vmem:[%s3391_s2 + $0xac] ss:$12 sps:$4 sm:$0xff]  }
   0x2   :  { %v2696_v4 = vsel %vm68_vm1, %v69_v3, 0  ;;  %v2367_v5 = vld [vmem:[%s3389_s1 + $0xc] ss:$16 sps:$4 sm:$0x7f]   ;;  %v2714_v12 = vld [vmem:[%s3390_s0] sm:$0xff]   ;;  %vm63_vm2 = vcmask 105472  }
   0x3   :  { %v75_v6 = vand.u32 %v2365_v0, %v2696_v4  ;;  %v2369_v7 = vld [vmem:[%s3389_s1] ss:$16 sps:$4 sm:$0x7f]   ;;  %v2370_v8 = vld [vmem:[%s3389_s1 + $0x8] ss:$16 sps:$4 sm:$0x7f]   ;;  %v81_v9 = vand.u32 %v2367_v5, %v2696_v4 }
   0x4   :  { %v72_v10 = vand.u32 %v2369_v7, %v2696_v4  ;;  %v78_v11 = vand.u32 %v2370_v8, %v2696_v4  ;;  %v2372_v14 = vld [vmem:[%s3391_s2 + $0xa8] ss:$12 sps:$4 sm:$0xff]   ;;  %v2377_v15 = vld [vmem:[%s3391_s2 + $0x22c] ss:$12 sps:$4 sm:$0xff]   ;;  %v2378_v19 = vld [vmem:[%s3391_s2 + $0x90] ss:$12 sps:$4 sm:$0xff]  }
   0x5   :  { %97 = vmatprep.subr.bf16.mxu0 %v75_v6  ;;  %140 = vmatprep.subr.bf16.mxu1 %v81_v9  ;;  %v2375_v16 = vld [vmem:[%s3391_s2 + $0x228] ss:$12 sps:$4 sm:$0xff]   ;;  %v2381_v20 = vld [vmem:[%s3391_s2 + $0x210] ss:$12 sps:$4 sm:$0xff]   ;;  %v2384_v23 = vld [vmem:[%s3391_s2 + $0x78] ss:$12 sps:$4 sm:$0xff]  }
   0x6   :  { %98 = vmatpush1.bf16.msra.mxu0 %v72_v10  ;;  %141 = vmatpush1.bf16.msra.mxu1 %v78_v11  ;;  %v2380_v17 = vld [vmem:[%s3391_s2 + $0x94] ss:$12 sps:$4 sm:$0xff]   ;;  %v2386_v21 = vld [vmem:[%s3391_s2 + $0x7c] ss:$12 sps:$4 sm:$0xff]   ;;  %v2387_v24 = vld [vmem:[%s3391_s2 + $0x1f8] ss:$12 sps:$4 sm:$0xff]  }
   0x7   :  { %838 = vmatprep.subr.bf16.mxu0 %v2374_v13  ;;  %881 = vmatprep.subr.bf16.mxu1 %v2377_v15  ;;  %v2383_v18 = vld [vmem:[%s3391_s2 + $0x214] ss:$12 sps:$4 sm:$0xff]   ;;  %v2389_v22 = vld [vmem:[%s3391_s2 + $0x1fc] ss:$12 sps:$4 sm:$0xff]   ;;  %v2392_v25 = vld [vmem:[%s3391_s2 + $0x64] ss:$12 sps:$4 sm:$0xff]  }
   0x8   :  { %v2395_v26 = vld [vmem:[%s3391_s2 + $0x1e4] ss:$12 sps:$4 sm:$0xff]   ;;  %v2390_v27 = vld [vmem:[%s3391_s2 + $0x60] ss:$12 sps:$4 sm:$0xff]   ;;  %v2396_v31 = vld [vmem:[%s3391_s2 + $0x48] ss:$12 sps:$4 sm:$0xff]  }
   0x9   :  { %2073 = vmatmul.mubr.msk.bf16.vlgmr.msra.gmra.mxu0 %vm63_vm2, %v2714_v12  ;;  %2074 = vmatmul.mubr.msk.bf16.vlgmr.msra.gmra.mxu1 %vm63_vm2, %v2714_v12  ;;  %v2393_v28 = vld [vmem:[%s3391_s2 + $0x1e0] ss:$12 sps:$4 sm:$0xff]   ;;  %v2399_v32 = vld [vmem:[%s3391_s2 + $0x1c8] ss:$12 sps:$4 sm:$0xff]   ;;  %v2402_v35 = vld [vmem:[%s3391_s2 + $0x30] ss:$12 sps:$4 sm:$0xff]  }
   0xa   :  { %839 = vmatpush1.bf16.msra.mxu0 %v2372_v14  ;;  %882 = vmatpush1.bf16.msra.mxu1 %v2375_v16  ;;  %v2398_v29 = vld [vmem:[%s3391_s2 + $0x4c] ss:$12 sps:$4 sm:$0xff]   ;;  %v2404_v33 = vld [vmem:[%s3391_s2 + $0x34] ss:$12 sps:$4 sm:$0xff]   ;;  %v2405_v36 = vld [vmem:[%s3391_s2 + $0x1b0] ss:$12 sps:$4 sm:$0xff]  }
   0xb   :  { %840 = vmatprep.subr.bf16.mxu0 %v2380_v17  ;;  %883 = vmatprep.subr.bf16.mxu1 %v2383_v18  ;;  %v2401_v30 = vld [vmem:[%s3391_s2 + $0x1cc] ss:$12 sps:$4 sm:$0xff]   ;;  %v2407_v34 = vld [vmem:[%s3391_s2 + $0x1b4] ss:$12 sps:$4 sm:$0xff]   ;;  %v2410_v37 = vld [vmem:[%s3391_s2 + $0x1c] ss:$12 sps:$4 sm:$0xff]  }
   0xc   :  { %v2413_v38 = vld [vmem:[%s3391_s2 + $0x19c] ss:$12 sps:$4 sm:$0xff]   ;;  %v2408_v39 = vld [vmem:[%s3391_s2 + $0x18] ss:$12 sps:$4 sm:$0xff]   ;;  %v2414_v43 = vld [vmem:[%s3391_s2] ss:$12 sps:$4 sm:$0xff]  }
   0xd   :  { %v2411_v40 = vld [vmem:[%s3391_s2 + $0x198] ss:$12 sps:$4 sm:$0xff]   ;;  %v2417_v44 = vld [vmem:[%s3391_s2 + $0x180] ss:$12 sps:$4 sm:$0xff]   ;;  %v2420_v47 = vld [vmem:[%s3391_s2 + $0x168] ss:$12 sps:$4 sm:$0xff]  }
   0xe   :  { %841 = vmatpush1.bf16.msra.mxu0 %v2378_v19  ;;  %884 = vmatpush1.bf16.msra.mxu1 %v2381_v20  ;;  %v2416_v41 = vld [vmem:[%s3391_s2 + $0x4] ss:$12 sps:$4 sm:$0xff]   ;;  %v2422_v45 = vld [vmem:[%s3391_s2 + $0x16c] ss:$12 sps:$4 sm:$0xff]   ;;  %v2423_v48 = vld [vmem:[%s3391_s2 + $0x2e8] ss:$12 sps:$4 sm:$0xff]  }
   0xf   :  { %842 = vmatprep.subr.bf16.mxu0 %v2386_v21  ;;  %885 = vmatprep.subr.bf16.mxu1 %v2389_v22  ;;  %v2419_v42 = vld [vmem:[%s3391_s2 + $0x184] ss:$12 sps:$4 sm:$0xff]   ;;  %v2425_v46 = vld [vmem:[%s3391_s2 + $0x2ec] ss:$12 sps:$4 sm:$0xff]   ;;  %v2428_v49 = vld [vmem:[%s3391_s2 + $0x154] ss:$12 sps:$4 sm:$0xff]  }
  0x10   :  { %v2431_v50 = vld [vmem:[%s3391_s2 + $0x2d4] ss:$12 sps:$4 sm:$0xff]   ;;  %v2426_v51 = vld [vmem:[%s3391_s2 + $0x150] ss:$12 sps:$4 sm:$0xff]   ;;  %v2432_v55 = vld [vmem:[%s3391_s2 + $0x138] ss:$12 sps:$4 sm:$0xff]  }
  0x11   :  { %v2429_v52 = vld [vmem:[%s3391_s2 + $0x2d0] ss:$12 sps:$4 sm:$0xff]   ;;  %v2435_v56 = vld [vmem:[%s3391_s2 + $0x2b8] ss:$12 sps:$4 sm:$0xff]   ;;  %v2438_v59 = vld [vmem:[%s3391_s2 + $0x120] ss:$12 sps:$4 sm:$0xff]  }
  0x12   :  { %843 = vmatpush1.bf16.msra.mxu0 %v2384_v23  ;;  %886 = vmatpush1.bf16.msra.mxu1 %v2387_v24  ;;  %v2434_v53 = vld [vmem:[%s3391_s2 + $0x13c] ss:$12 sps:$4 sm:$0xff]   ;;  %v2440_v57 = vld [vmem:[%s3391_s2 + $0x124] ss:$12 sps:$4 sm:$0xff]   ;;  %v2441_v60 = vld [vmem:[%s3391_s2 + $0x2a0] ss:$12 sps:$4 sm:$0xff]  }
  0x13   :  { %844 = vmatprep.subr.bf16.mxu0 %v2392_v25  ;;  %887 = vmatprep.subr.bf16.mxu1 %v2395_v26  ;;  %v2437_v54 = vld [vmem:[%s3391_s2 + $0x2bc] ss:$12 sps:$4 sm:$0xff]   ;;  %v2443_v58 = vld [vmem:[%s3391_s2 + $0x2a4] ss:$12 sps:$4 sm:$0xff]   ;;  %v2446_v61 = vld [vmem:[%s3391_s2 + $0x10c] ss:$12 sps:$4 sm:$0xff]  }
  0x14   :  { %v2449_v62 = vld [vmem:[%s3391_s2 + $0x28c] ss:$12 sps:$4 sm:$0xff]   ;;  %v2444_v63 = vld [vmem:[%s3391_s2 + $0x108] ss:$12 sps:$4 sm:$0xff]   ;;  %v2450_v5 = vld [vmem:[%s3391_s2 + $0xf0] ss:$12 sps:$4 sm:$0xff]  }
  0x15   :  { %v2447_v0 = vld [vmem:[%s3391_s2 + $0x288] ss:$12 sps:$4 sm:$0xff]   ;;  %v2453_v6 = vld [vmem:[%s3391_s2 + $0x270] ss:$12 sps:$4 sm:$0xff]   ;;  %v2456_v9 = vld [vmem:[%s3391_s2 + $0xd8] ss:$12 sps:$4 sm:$0xff]  }
  0x16   :  { %845 = vmatpush1.bf16.msra.mxu0 %v2390_v27  ;;  %888 = vmatpush1.bf16.msra.mxu1 %v2393_v28  ;;  %v2452_v2 = vld [vmem:[%s3391_s2 + $0xf4] ss:$12 sps:$4 sm:$0xff]   ;;  %v2458_v7 = vld [vmem:[%s3391_s2 + $0xdc] ss:$12 sps:$4 sm:$0xff]   ;;  %v2459_v10 = vld [vmem:[%s3391_s2 + $0x258] ss:$12 sps:$4 sm:$0xff]  }
  0x17   :  { %846 = vmatprep.subr.bf16.mxu0 %v2398_v29  ;;  %889 = vmatprep.subr.bf16.mxu1 %v2401_v30  ;;  %v2455_v3 = vld [vmem:[%s3391_s2 + $0x274] ss:$12 sps:$4 sm:$0xff]   ;;  %v2461_v8 = vld [vmem:[%s3391_s2 + $0x25c] ss:$12 sps:$4 sm:$0xff]   ;;  %v2464_v11 = vld [vmem:[%s3391_s2 + $0xc4] ss:$12 sps:$4 sm:$0xff]  }
  0x18   :  { %v2467_v13 = vld [vmem:[%s3391_s2 + $0x244] ss:$12 sps:$4 sm:$0xff]   ;;  %v2462_v14 = vld [vmem:[%s3391_s2 + $0xc0] ss:$12 sps:$4 sm:$0xff]   ;;  %vm1036_vm3 = vcmask 359424   ;;  %vm2049_vm4 = vcmask 7168  }
  0x19   :  { %v2465_v15 = vld [vmem:[%s3391_s2 + $0x240] ss:$12 sps:$4 sm:$0xff]   ;;  %v2468_v16 = vld [vmem:[%s3391_s2 + $0x170] ss:$12 sps:$4 sm:$0xff]   ;;  %vm2061_vm5 = vcmask 15368  }
  0x1a   :  { %847 = vmatpush1.bf16.msra.mxu0 %v2396_v31  ;;  %890 = vmatpush1.bf16.msra.mxu1 %v2399_v32  ;;  %v2469_v17 = vld [vmem:[%s3391_s2 + $0x2f0] ss:$12 sps:$4 sm:$0xff]  }
  0x1b   :  { %848 = vmatprep.subr.bf16.mxu0 %v2404_v33  ;;  %891 = vmatprep.subr.bf16.mxu1 %v2407_v34 }
  0x1e   :  { %849 = vmatpush1.bf16.msra.mxu0 %v2402_v35  ;;  %892 = vmatpush1.bf16.msra.mxu1 %v2405_v36  ;;  %v2470_v36 = vld [vmem:[%s3391_s2 + $0xb0] ss:$12 sps:$4 sm:$0xff]  }
  0x1f   :  { %850 = vmatprep.subr.bf16.mxu0 %v2410_v37  ;;  %893 = vmatprep.subr.bf16.mxu1 %v2413_v38  ;;  %v2471_v37 = vld [vmem:[%s3391_s2 + $0x230] ss:$12 sps:$4 sm:$0xff]  }
  0x22   :  { %851 = vmatpush1.bf16.msra.mxu0 %v2408_v39  ;;  %894 = vmatpush1.bf16.msra.mxu1 %v2411_v40  ;;  %v2472_v40 = vld [vmem:[%s3391_s2 + $0x158] ss:$12 sps:$4 sm:$0xff]  }
  0x23   :  { %852 = vmatprep.subr.bf16.mxu0 %v2416_v41  ;;  %895 = vmatprep.subr.bf16.mxu1 %v2419_v42  ;;  %v2473_v41 = vld [vmem:[%s3391_s2 + $0x2d8] ss:$12 sps:$4 sm:$0xff]  }
  0x24   :  { %v2474_v42 = vld [vmem:[%s3391_s2 + $0x98] ss:$12 sps:$4 sm:$0xff]  }
  0x26   :  { %853 = vmatpush1.bf16.msra.mxu0 %v2414_v43  ;;  %896 = vmatpush1.bf16.msra.mxu1 %v2417_v44  ;;  %v2475_v43 = vld [vmem:[%s3391_s2 + $0x218] ss:$12 sps:$4 sm:$0xff]   ;;  %v2476_v44 = vld [vmem:[%s3391_s2 + $0x140] ss:$12 sps:$4 sm:$0xff]  }
  0x27   :  { %854 = vmatprep.subr.bf16.mxu0 %v2422_v45  ;;  %897 = vmatprep.subr.bf16.mxu1 %v2425_v46  ;;  %v2477_v45 = vld [vmem:[%s3391_s2 + $0x2c0] ss:$12 sps:$4 sm:$0xff]  }
  0x28   :  { %v2478_v46 = vld [vmem:[%s3391_s2 + $0x80] ss:$12 sps:$4 sm:$0xff]  }
  0x2a   :  { %855 = vmatpush2.bf16.msra.mxu0 %v2420_v47  ;;  %898 = vmatpush2.bf16.msra.mxu1 %v2423_v48  ;;  %v2479_v47 = vld [vmem:[%s3391_s2 + $0x200] ss:$12 sps:$4 sm:$0xff]   ;;  %v2480_v48 = vld [vmem:[%s3391_s2 + $0x128] ss:$12 sps:$4 sm:$0xff]  }
  0x2b   :  { %856 = vmatprep.subr.bf16.mxu0 %v2428_v49  ;;  %899 = vmatprep.subr.bf16.mxu1 %v2431_v50  ;;  %v2481_v49 = vld [vmem:[%s3391_s2 + $0x2a8] ss:$12 sps:$4 sm:$0xff]  }
  0x2c   :  { %v2482_v50 = vld [vmem:[%s3391_s2 + $0x68] ss:$12 sps:$4 sm:$0xff]  }
  0x2e   :  { %857 = vmatpush2.bf16.msra.mxu0 %v2426_v51  ;;  %900 = vmatpush2.bf16.msra.mxu1 %v2429_v52  ;;  %v2483_v51 = vld [vmem:[%s3391_s2 + $0x1e8] ss:$12 sps:$4 sm:$0xff]   ;;  %v2484_v52 = vld [vmem:[%s3391_s2 + $0x110] ss:$12 sps:$4 sm:$0xff]  }
  0x2f   :  { %858 = vmatprep.subr.bf16.mxu0 %v2434_v53  ;;  %901 = vmatprep.subr.bf16.mxu1 %v2437_v54  ;;  %v2485_v53 = vld [vmem:[%s3391_s2 + $0x290] ss:$12 sps:$4 sm:$0xff]  }
  0x30   :  { %v2486_v54 = vld [vmem:[%s3391_s2 + $0x50] ss:$12 sps:$4 sm:$0xff]  }
  0x32   :  { %859 = vmatpush2.bf16.msra.mxu0 %v2432_v55  ;;  %902 = vmatpush2.bf16.msra.mxu1 %v2435_v56  ;;  %v2487_v55 = vld [vmem:[%s3391_s2 + $0x1d0] ss:$12 sps:$4 sm:$0xff]   ;;  %v2488_v56 = vld [vmem:[%s3391_s2 + $0xf8] ss:$12 sps:$4 sm:$0xff]  }
  0x33   :  { %860 = vmatprep.subr.bf16.mxu0 %v2440_v57  ;;  %903 = vmatprep.subr.bf16.mxu1 %v2443_v58  ;;  %v2489_v57 = vld [vmem:[%s3391_s2 + $0x278] ss:$12 sps:$4 sm:$0xff]  }
  0x34   :  { %v2490_v58 = vld [vmem:[%s3391_s2 + $0x38] ss:$12 sps:$4 sm:$0xff]  }
  0x36   :  { %861 = vmatpush2.bf16.msra.mxu0 %v2438_v59  ;;  %904 = vmatpush2.bf16.msra.mxu1 %v2441_v60  ;;  %v2491_v59 = vld [vmem:[%s3391_s2 + $0x1b8] ss:$12 sps:$4 sm:$0xff]   ;;  %v2492_v60 = vld [vmem:[%s3391_s2 + $0xe0] ss:$12 sps:$4 sm:$0xff]  }
  0x37   :  { %862 = vmatprep.subr.bf16.mxu0 %v2446_v61  ;;  %905 = vmatprep.subr.bf16.mxu1 %v2449_v62  ;;  %v2493_v61 = vld [vmem:[%s3391_s2 + $0x260] ss:$12 sps:$4 sm:$0xff]  }
  0x38   :  { %v2494_v62 = vld [vmem:[%s3391_s2 + $0x20] ss:$12 sps:$4 sm:$0xff]  }
  0x3a   :  { %863 = vmatpush2.bf16.msra.mxu0 %v2444_v63  ;;  %906 = vmatpush2.bf16.msra.mxu1 %v2447_v0  ;;  %v2495_v63 = vld [vmem:[%s3391_s2 + $0x1a0] ss:$12 sps:$4 sm:$0xff]   ;;  %v2496_v0 = vld [vmem:[%s3391_s2 + $0xc8] ss:$12 sps:$4 sm:$0xff]  }
  0x3b   :  { %864 = vmatprep.subr.bf16.mxu0 %v2452_v2  ;;  %907 = vmatprep.subr.bf16.mxu1 %v2455_v3  ;;  %v2497_v2 = vld [vmem:[%s3391_s2 + $0x248] ss:$12 sps:$4 sm:$0xff]  }
  0x3c   :  { %v2502_v3 = vld [vmem:[%s3392_s4 + $0x4] ss:$16 sps:$4 sm:$0x7f]  }
  0x3e   :  { %865 = vmatpush2.bf16.msra.mxu0 %v2450_v5  ;;  %908 = vmatpush2.bf16.msra.mxu1 %v2453_v6  ;;  %v2505_v5 = vld [vmem:[%s3392_s4 + $0xc] ss:$16 sps:$4 sm:$0x7f]   ;;  %v2498_v6 = vld [vmem:[%s3391_s2 + $0x8] ss:$12 sps:$4 sm:$0xff]  }
  0x3f   :  { %866 = vmatprep.subr.bf16.mxu0 %v2458_v7  ;;  %909 = vmatprep.subr.bf16.mxu1 %v2461_v8  ;;  %v2499_v7 = vld [vmem:[%s3391_s2 + $0x188] ss:$12 sps:$4 sm:$0xff]   ;;  %v2500_v8 = vld [vmem:[%s3392_s4] ss:$16 sps:$4 sm:$0x7f]  }
  0x42   :  { %867 = vmatpush2.bf16.msra.mxu0 %v2456_v9  ;;  %910 = vmatpush2.bf16.msra.mxu1 %v2459_v10  ;;  %v2503_v9 = vld [vmem:[%s3392_s4 + $0x8] ss:$16 sps:$4 sm:$0x7f]   ;;  %v1070_v10 = vand.u32 %v2502_v3, %v2696_v4  ;;  %v2584_v3 = vld [vmem:[%s3393_s5 + $0xf0] ss:$12 sps:$4 sm:$0xff]  }
  0x43   :  { %868 = vmatprep.subr.bf16.mxu0 %v2464_v11  ;;  %911 = vmatprep.subr.bf16.mxu1 %v2467_v13  ;;  %v1076_v11 = vand.u32 %v2505_v5, %v2696_v4  ;;  %v1067_v13 = vand.u32 %v2500_v8, %v2696_v4  ;;  %v2587_v5 = vld [vmem:[%s3393_s5 + $0x270] ss:$12 sps:$4 sm:$0xff]   ;;  %v2590_v8 = vld [vmem:[%s3393_s5 + $0xd8] ss:$12 sps:$4 sm:$0xff]  }
  0x46   :  { %869 = vmatpush2.bf16.msra.mxu0 %v2462_v14  ;;  %912 = vmatpush2.bf16.msra.mxu1 %v2465_v15  ;;  %v1073_v14 = vand.u32 %v2503_v9, %v2696_v4  ;;  %v2508_v15 = vld [vmem:[%s3393_s5 + $0xac] ss:$12 sps:$4 sm:$0xff]   ;;  %v2506_v4 = vld [vmem:[%s3393_s5 + $0xa8] ss:$12 sps:$4 sm:$0xff]  }
  0x47   :  { %2275 = vmatprep.subr.bf16.mxu0 %v2468_v16  ;;  %2297 = vmatprep.subr.bf16.mxu1 %v2469_v17  ;;  %v2511_v16 = vld [vmem:[%s3393_s5 + $0x22c] ss:$12 sps:$4 sm:$0xff]   ;;  %v2509_v17 = vld [vmem:[%s3393_s5 + $0x228] ss:$12 sps:$4 sm:$0xff]  }
  0x48   :  { %v2593_v9 = vld [vmem:[%s3393_s5 + $0x258] ss:$12 sps:$4 sm:$0xff]  }
  0xc9   :  { %v117_v18 = vpop.f32.mrf.mxu0  ;;  %v160_v19 = vpop.f32.mrf.mxu1 }
  0xca   :  { %v169_v32 = vmax.f32 %v117_v18, 0.0  ;;  %v171_v33 = vmax.f32 %v160_v19, 0.0  ;;  %v2514_v18 = vld [vmem:[%s3393_s5 + $0x94] ss:$12 sps:$4 sm:$0xff]  }
  0xcb   :  { %v119_v20 = vpop.f32.mrf.mxu0  ;;  %v162_v21 = vpop.f32.mrf.mxu1  ;;  %v2517_v19 = vld [vmem:[%s3393_s5 + $0x214] ss:$12 sps:$4 sm:$0xff]  }
  0xcc   :  { %v170_v28 = vmax.f32 %v119_v20, 0.0  ;;  %v172_v29 = vmax.f32 %v162_v21, 0.0  ;;  %v2515_v20 = vld [vmem:[%s3393_s5 + $0x210] ss:$12 sps:$4 sm:$0xff]  }
  0xcd   :  { %v121_v22 = vpop.f32.mrf.mxu0  ;;  %v164_v23 = vpop.f32.mrf.mxu1  ;;  %v2520_v21 = vld [vmem:[%s3393_s5 + $0x7c] ss:$12 sps:$4 sm:$0xff]  }
  0xce   :  { %v173_v24 = vmax.f32 %v121_v22, 0.0  ;;  %v175_v25 = vmax.f32 %v164_v23, 0.0  ;;  %v2518_v22 = vld [vmem:[%s3393_s5 + $0x78] ss:$12 sps:$4 sm:$0xff]  }
  0xcf   :  { %v123_v26 = vpop.f32.mrf.mxu0  ;;  %v166_v27 = vpop.f32.mrf.mxu1  ;;  %v2521_v23 = vld [vmem:[%s3393_s5 + $0x1f8] ss:$12 sps:$4 sm:$0xff]  }
  0xd0   :  { %v174_v30 = vmax.f32 %v123_v26, 0.0  ;;  %v176_v31 = vmax.f32 %v166_v27, 0.0  ;;  %v2924_v38 = vpack.c.bf16 %v173_v24, %v169_v32  ;;  %v2926_v39 = vpack.c.bf16 %v175_v25, %v171_v33  ;;  %v2526_v24 = vld [vmem:[%s3393_s5 + $0x64] ss:$12 sps:$4 sm:$0xff]   ;;  %v2524_v26 = vld [vmem:[%s3393_s5 + $0x60] ss:$12 sps:$4 sm:$0xff]  }
  0xd1   :  { %v2529_v25 = vld [vmem:[%s3393_s5 + $0x1e4] ss:$12 sps:$4 sm:$0xff]   ;;  %v2527_v27 = vld [vmem:[%s3393_s5 + $0x1e0] ss:$12 sps:$4 sm:$0xff]  }
  0xd2   :  { %v178_v34 = vpack.c.bf16 %v174_v30, %v170_v28  ;;  %v180_v35 = vpack.c.bf16 %v176_v31, %v172_v29  ;;  %v2532_v28 = vld [vmem:[%s3393_s5 + $0x4c] ss:$12 sps:$4 sm:$0xff]   ;;  %v2530_v30 = vld [vmem:[%s3393_s5 + $0x48] ss:$12 sps:$4 sm:$0xff]  }
  0xd3   :  { %v2535_v29 = vld [vmem:[%s3393_s5 + $0x1cc] ss:$12 sps:$4 sm:$0xff]   ;;  %v2533_v31 = vld [vmem:[%s3393_s5 + $0x1c8] ss:$12 sps:$4 sm:$0xff]  }
  0xd4   :  { %870 = vmatprep.mubr.bf16.mxu0 %v178_v34  ;;  %913 = vmatprep.mubr.bf16.mxu1 %v180_v35  ;;  %v2538_v32 = vld [vmem:[%s3393_s5 + $0x34] ss:$12 sps:$4 sm:$0xff]  }
  0xd5   :  { %871 = vmatmul.mubr.bf16.vlgmr.msra.gmra.mxu0 %v2924_v38  ;;  %914 = vmatmul.mubr.bf16.vlgmr.msra.gmra.mxu1 %v2926_v39  ;;  %v2541_v33 = vld [vmem:[%s3393_s5 + $0x1b4] ss:$12 sps:$4 sm:$0xff]  }
  0xd6   :  { %2276 = vmatpush3.bf16.msra.mxu0 %v2470_v36  ;;  %2298 = vmatpush3.bf16.msra.mxu1 %v2471_v37  ;;  %v2544_v36 = vld [vmem:[%s3393_s5 + $0x1c] ss:$12 sps:$4 sm:$0xff]  }
  0xd7   :  { %956 = vmatprep.mubr.bf16.mxu0 %v178_v34  ;;  %997 = vmatprep.mubr.bf16.mxu1 %v180_v35  ;;  %v2536_v34 = vld [vmem:[%s3393_s5 + $0x30] ss:$12 sps:$4 sm:$0xff]  }
  0xd8   :  { %2277 = vmatprep.subr.bf16.mxu0 %v2472_v40  ;;  %2299 = vmatprep.subr.bf16.mxu1 %v2473_v41  ;;  %v2539_v35 = vld [vmem:[%s3393_s5 + $0x1b0] ss:$12 sps:$4 sm:$0xff]   ;;  %v2548_v40 = vld [vmem:[%s3393_s5] ss:$12 sps:$4 sm:$0xff]  }
  0xd9   :  { %v2547_v37 = vld [vmem:[%s3393_s5 + $0x19c] ss:$12 sps:$4 sm:$0xff]   ;;  %v2550_v41 = vld [vmem:[%s3393_s5 + $0x4] ss:$12 sps:$4 sm:$0xff]  }
  0xda   :  { %2278 = vmatpush3.bf16.msra.mxu0 %v2474_v42  ;;  %2300 = vmatpush3.bf16.msra.mxu1 %v2475_v43  ;;  %v2551_v42 = vld [vmem:[%s3393_s5 + $0x180] ss:$12 sps:$4 sm:$0xff]   ;;  %v2553_v43 = vld [vmem:[%s3393_s5 + $0x184] ss:$12 sps:$4 sm:$0xff]  }
  0xdb   :  { %2279 = vmatprep.subr.bf16.mxu0 %v2476_v44  ;;  %2301 = vmatprep.subr.bf16.mxu1 %v2477_v45  ;;  %v2556_v44 = vld [vmem:[%s3393_s5 + $0x16c] ss:$12 sps:$4 sm:$0xff]  }
  0xdc   :  { %v2559_v45 = vld [vmem:[%s3393_s5 + $0x2ec] ss:$12 sps:$4 sm:$0xff]  }
  0xde   :  { %2280 = vmatpush3.bf16.msra.mxu0 %v2478_v46  ;;  %2302 = vmatpush3.bf16.msra.mxu1 %v2479_v47  ;;  %v2554_v46 = vld [vmem:[%s3393_s5 + $0x168] ss:$12 sps:$4 sm:$0xff]  }
  0xdf   :  { %2281 = vmatprep.subr.bf16.mxu0 %v2480_v48  ;;  %2303 = vmatprep.subr.bf16.mxu1 %v2481_v49  ;;  %v2557_v47 = vld [vmem:[%s3393_s5 + $0x2e8] ss:$12 sps:$4 sm:$0xff]  }
  0xe0   :  { %v2562_v48 = vld [vmem:[%s3393_s5 + $0x154] ss:$12 sps:$4 sm:$0xff]  }
  0xe1   :  { %v2565_v49 = vld [vmem:[%s3393_s5 + $0x2d4] ss:$12 sps:$4 sm:$0xff]  }
  0xe2   :  { %2282 = vmatpush3.bf16.msra.mxu0 %v2482_v50  ;;  %2304 = vmatpush3.bf16.msra.mxu1 %v2483_v51  ;;  %v2560_v50 = vld [vmem:[%s3393_s5 + $0x150] ss:$12 sps:$4 sm:$0xff]  }
  0xe3   :  { %2283 = vmatprep.subr.bf16.mxu0 %v2484_v52  ;;  %2305 = vmatprep.subr.bf16.mxu1 %v2485_v53  ;;  %v2563_v51 = vld [vmem:[%s3393_s5 + $0x2d0] ss:$12 sps:$4 sm:$0xff]  }
  0xe4   :  { %v2568_v52 = vld [vmem:[%s3393_s5 + $0x13c] ss:$12 sps:$4 sm:$0xff]  }
  0xe5   :  { %v2571_v53 = vld [vmem:[%s3393_s5 + $0x2bc] ss:$12 sps:$4 sm:$0xff]  }
  0xe6   :  { %2284 = vmatpush3.bf16.msra.mxu0 %v2486_v54  ;;  %2306 = vmatpush3.bf16.msra.mxu1 %v2487_v55  ;;  %v2566_v54 = vld [vmem:[%s3393_s5 + $0x138] ss:$12 sps:$4 sm:$0xff]  }
  0xe7   :  { %2285 = vmatprep.subr.bf16.mxu0 %v2488_v56  ;;  %2307 = vmatprep.subr.bf16.mxu1 %v2489_v57  ;;  %v2569_v55 = vld [vmem:[%s3393_s5 + $0x2b8] ss:$12 sps:$4 sm:$0xff]  }
  0xe8   :  { %v2574_v56 = vld [vmem:[%s3393_s5 + $0x124] ss:$12 sps:$4 sm:$0xff]  }
  0xe9   :  { %v2577_v57 = vld [vmem:[%s3393_s5 + $0x2a4] ss:$12 sps:$4 sm:$0xff]  }
  0xea   :  { %2286 = vmatpush3.bf16.msra.mxu0 %v2490_v58  ;;  %2308 = vmatpush3.bf16.msra.mxu1 %v2491_v59  ;;  %v2572_v58 = vld [vmem:[%s3393_s5 + $0x120] ss:$12 sps:$4 sm:$0xff]  }
  0xeb   :  { %2287 = vmatprep.subr.bf16.mxu0 %v2492_v60  ;;  %2309 = vmatprep.subr.bf16.mxu1 %v2493_v61  ;;  %v2575_v59 = vld [vmem:[%s3393_s5 + $0x2a0] ss:$12 sps:$4 sm:$0xff]  }
  0xec   :  { %v2580_v60 = vld [vmem:[%s3393_s5 + $0x10c] ss:$12 sps:$4 sm:$0xff]  }
  0xed   :  { %v2583_v61 = vld [vmem:[%s3393_s5 + $0x28c] ss:$12 sps:$4 sm:$0xff]  }
  0xee   :  { %2288 = vmatpush3.bf16.msra.mxu0 %v2494_v62  ;;  %2310 = vmatpush3.bf16.msra.mxu1 %v2495_v63  ;;  %v2578_v62 = vld [vmem:[%s3393_s5 + $0x108] ss:$12 sps:$4 sm:$0xff]  }
  0xef   :  { %2289 = vmatprep.subr.bf16.mxu0 %v2496_v0  ;;  %2311 = vmatprep.subr.bf16.mxu1 %v2497_v2  ;;  %v2581_v63 = vld [vmem:[%s3393_s5 + $0x288] ss:$12 sps:$4 sm:$0xff]  }
  0xf0   :  { %v2586_v0 = vld [vmem:[%s3393_s5 + $0xf4] ss:$12 sps:$4 sm:$0xff]  }
  0xf1   :  { %v2589_v2 = vld [vmem:[%s3393_s5 + $0x274] ss:$12 sps:$4 sm:$0xff]  }
  0xf2   :  { %2290 = vmatpush3.bf16.msra.mxu0 %v2498_v6  ;;  %2312 = vmatpush3.bf16.msra.mxu1 %v2499_v7  ;;  %v2592_v6 = vld [vmem:[%s3393_s5 + $0xdc] ss:$12 sps:$4 sm:$0xff]  }
  0xf3   :  { %1092 = vmatprep.subr.bf16.mxu0 %v1070_v10  ;;  %1135 = vmatprep.subr.bf16.mxu1 %v1076_v11  ;;  %v2595_v7 = vld [vmem:[%s3393_s5 + $0x25c] ss:$12 sps:$4 sm:$0xff]   ;;  %v2598_v10 = vld [vmem:[%s3393_s5 + $0xc4] ss:$12 sps:$4 sm:$0xff]  }
  0xf4   :  { %v2601_v11 = vld [vmem:[%s3393_s5 + $0x244] ss:$12 sps:$4 sm:$0xff]  }
  0xf5   :  { %957 = vmatmul.mubr.bf16.vlgmr.msra.gmra.mxu0 %v2924_v38  ;;  %998 = vmatmul.mubr.bf16.vlgmr.msra.gmra.mxu1 %v2926_v39  ;;  %v2542_v38 = vld [vmem:[%s3393_s5 + $0x18] ss:$12 sps:$4 sm:$0xff]  }
  0xf6   :  { %1093 = vmatpush1.bf16.msra.mxu0 %v1067_v13  ;;  %1136 = vmatpush1.bf16.msra.mxu1 %v1073_v14  ;;  %v2545_v39 = vld [vmem:[%s3393_s5 + $0x198] ss:$12 sps:$4 sm:$0xff]   ;;  %v2596_v13 = vld [vmem:[%s3393_s5 + $0xc0] ss:$12 sps:$4 sm:$0xff]  }
  0xf7   :  { %1110 = vmatprep.mubr.bf16.mxu0 %v2634_v1  ;;  %1153 = vmatprep.mubr.bf16.mxu1 %v2634_v1  ;;  %v2512_v1 = vld [vmem:[%s3393_s5 + $0x90] ss:$12 sps:$4 sm:$0xff]   ;;  %v2599_v14 = vld [vmem:[%s3393_s5 + $0x240] ss:$12 sps:$4 sm:$0xff]  }
  0xf8   :  { %1833 = vmatprep.subr.bf16.mxu0 %v2508_v15  ;;  %1876 = vmatprep.subr.bf16.mxu1 %v2511_v16  ;;  %v2602_v15 = vld [vmem:[%s3393_s5 + $0x170] ss:$12 sps:$4 sm:$0xff]  }
  0xf9   :  { %v2603_v16 = vld [vmem:[%s3393_s5 + $0x2f0] ss:$12 sps:$4 sm:$0xff]  }
  0xfd   :  { %2175 = vmatmul.mubr.msk.bf16.vlgmr.msra.gmra.mxu0 %vm63_vm2, %v2714_v12  ;;  %2176 = vmatmul.mubr.msk.bf16.vlgmr.msra.gmra.mxu1 %vm63_vm2, %v2714_v12  ;;  %v2523_v12 = vld [vmem:[%s3393_s5 + $0x1fc] ss:$12 sps:$4 sm:$0xff]  }
  0xfe   :  { %1834 = vmatpush1.bf16.msra.mxu0 %v2506_v4  ;;  %1877 = vmatpush1.bf16.msra.mxu1 %v2509_v17  ;;  %v311_v4 = vlaneseq }
  0xff   :  { %1835 = vmatprep.subr.bf16.mxu0 %v2514_v18  ;;  %1878 = vmatprep.subr.bf16.mxu1 %v2517_v19 }
 0x100   :  { %v312_v17 = vshrl.u32 %v311_v4, 7 }
 0x102   :  { %1836 = vmatpush1.bf16.msra.mxu0 %v2512_v1  ;;  %1879 = vmatpush1.bf16.msra.mxu1 %v2515_v20  ;;  %v3236_v1 = vsub.s32 1, %v312_v17  ;;  %v3238_v20 = vsub.s32 0, %v312_v17 }
 0x103   :  { %1837 = vmatprep.subr.bf16.mxu0 %v2520_v21  ;;  %1880 = vmatprep.subr.bf16.mxu1 %v2523_v12 }
 0x106   :  { %1838 = vmatpush1.bf16.msra.mxu0 %v2518_v22  ;;  %1881 = vmatpush1.bf16.msra.mxu1 %v2521_v23  ;;  %v309_v22 = vld [vmem:[%s3394_s3] sm:$0x7] }
 0x107   :  { %1839 = vmatprep.subr.bf16.mxu0 %v2526_v24  ;;  %1882 = vmatprep.subr.bf16.mxu1 %v2529_v25  ;;  %v318_v23 = vrot.slane %v309_v22, %v3236_v1  ;;  %v314_v24 = vrot.slane %v309_v22, %v3238_v20 }
 0x10a   :  { %1840 = vmatpush1.bf16.msra.mxu0 %v2524_v26  ;;  %1883 = vmatpush1.bf16.msra.mxu1 %v2527_v27 }
 0x10b   :  { %1841 = vmatprep.subr.bf16.mxu0 %v2532_v28  ;;  %1884 = vmatprep.subr.bf16.mxu1 %v2535_v29  ;;  %v3245_v28 = vsub.s32 2, %v312_v17 }
 0x10e   :  { %1842 = vmatpush1.bf16.msra.mxu0 %v2530_v30  ;;  %1885 = vmatpush1.bf16.msra.mxu1 %v2533_v31 }
 0x10f   :  { %1843 = vmatprep.subr.bf16.mxu0 %v2538_v32  ;;  %1886 = vmatprep.subr.bf16.mxu1 %v2541_v33 }
 0x112   :  { %1844 = vmatpush1.bf16.msra.mxu0 %v2536_v34  ;;  %1887 = vmatpush1.bf16.msra.mxu1 %v2539_v35 }
 0x113   :  { %1845 = vmatprep.subr.bf16.mxu0 %v2544_v36  ;;  %1888 = vmatprep.subr.bf16.mxu1 %v2547_v37  ;;  %v322_v36 = vrot.slane %v309_v22, %v3245_v28 }
 0x116   :  { %1846 = vmatpush1.bf16.msra.mxu0 %v2542_v38  ;;  %1889 = vmatpush1.bf16.msra.mxu1 %v2545_v39 }
 0x117   :  { %1847 = vmatprep.subr.bf16.mxu0 %v2550_v41  ;;  %1890 = vmatprep.subr.bf16.mxu1 %v2553_v43  ;;  %v1012_v41 = vld [vmem:[%s3395_s7] sm:$0x7] }
 0x11a   :  { %1848 = vmatpush1.bf16.msra.mxu0 %v2548_v40  ;;  %1891 = vmatpush1.bf16.msra.mxu1 %v2551_v42 }
 0x11b   :  { %1849 = vmatprep.subr.bf16.mxu0 %v2556_v44  ;;  %1892 = vmatprep.subr.bf16.mxu1 %v2559_v45  ;;  %v1021_v44 = vrot.slane %v1012_v41, %v3236_v1 }
 0x11e   :  { %1850 = vmatpush2.bf16.msra.mxu0 %v2554_v46  ;;  %1893 = vmatpush2.bf16.msra.mxu1 %v2557_v47 }
 0x11f   :  { %1851 = vmatprep.subr.bf16.mxu0 %v2562_v48  ;;  %1894 = vmatprep.subr.bf16.mxu1 %v2565_v49 }
 0x122   :  { %1852 = vmatpush2.bf16.msra.mxu0 %v2560_v50  ;;  %1895 = vmatpush2.bf16.msra.mxu1 %v2563_v51  ;;  %v1017_v51 = vrot.slane %v1012_v41, %v3238_v20 }
 0x123   :  { %1853 = vmatprep.subr.bf16.mxu0 %v2568_v52  ;;  %1896 = vmatprep.subr.bf16.mxu1 %v2571_v53 }
 0x126   :  { %1854 = vmatpush2.bf16.msra.mxu0 %v2566_v54  ;;  %1897 = vmatpush2.bf16.msra.mxu1 %v2569_v55 }
 0x127   :  { %1855 = vmatprep.subr.bf16.mxu0 %v2574_v56  ;;  %1898 = vmatprep.subr.bf16.mxu1 %v2577_v57  ;;  %v1025_v57 = vrot.slane %v1012_v41, %v3245_v28  ;;  %v2609_v41 = vld [vmem:[%s3393_s5 + $0x218] ss:$12 sps:$4 sm:$0xff]  }
 0x12a   :  { %1856 = vmatpush2.bf16.msra.mxu0 %v2572_v58  ;;  %1899 = vmatpush2.bf16.msra.mxu1 %v2575_v59 }
 0x12b   :  { %1857 = vmatprep.subr.bf16.mxu0 %v2580_v60  ;;  %1900 = vmatprep.subr.bf16.mxu1 %v2583_v61 }
 0x12e   :  { %1858 = vmatpush2.bf16.msra.mxu0 %v2578_v62  ;;  %1901 = vmatpush2.bf16.msra.mxu1 %v2581_v63 }
 0x12f   :  { %1859 = vmatprep.subr.bf16.mxu0 %v2586_v0  ;;  %1902 = vmatprep.subr.bf16.mxu1 %v2589_v2 }
 0x132   :  { %1860 = vmatpush2.bf16.msra.mxu0 %v2584_v3  ;;  %1903 = vmatpush2.bf16.msra.mxu1 %v2587_v5 }
 0x133   :  { %1861 = vmatprep.subr.bf16.mxu0 %v2592_v6  ;;  %1904 = vmatprep.subr.bf16.mxu1 %v2595_v7 }
 0x136   :  { %1862 = vmatpush2.bf16.msra.mxu0 %v2590_v8  ;;  %1905 = vmatpush2.bf16.msra.mxu1 %v2593_v9 }
 0x137   :  { %1863 = vmatprep.subr.bf16.mxu0 %v2598_v10  ;;  %1906 = vmatprep.subr.bf16.mxu1 %v2601_v11 }
 0x13a   :  { %1864 = vmatpush2.bf16.msra.mxu0 %v2596_v13  ;;  %1907 = vmatpush2.bf16.msra.mxu1 %v2599_v14 }
 0x13b   :  { %2319 = vmatprep.subr.bf16.mxu0 %v2602_v15  ;;  %2341 = vmatprep.subr.bf16.mxu1 %v2603_v16 }
 0x195   :  { %v872_v18 = vpop.f32.mrf.mxu0  ;;  %v915_v19 = vpop.f32.mrf.mxu1 }
 0x196   :  { %v873_v29 = vadd.f32 %v872_v18, %v314_v24 }
 0x197   :  { %v874_v21 = vpop.f32.mrf.mxu0  ;;  %v917_v12 = vpop.f32.mrf.mxu1 }
 0x198   :  { %v875_v27 = vadd.f32 %v874_v21, %v318_v23  ;;  %v916_v37 = vadd.f32 %v915_v19, %v873_v29 }
 0x199   :  { %v876_v25 = vpop.f32.mrf.mxu0  ;;  %v919_v26 = vpop.f32.mrf.mxu1 }
 0x19a   :  { %v918_v32 = vadd.f32 %v917_v12, %v875_v27  ;;  %v877_v38 = vadd.f32 %v876_v25, %v314_v24  ;;  %v1006_v50 = vmax.f32 %v916_v37, 0.0 }
 0x19b   :  { %v878_v30 = vpop.f32.mrf.mxu0  ;;  %v921_v31 = vpop.f32.mrf.mxu1 }
 0x19c   :  { %v879_v35 = vadd.f32 %v878_v30, %v318_v23  ;;  %v1007_v43 = vmax.f32 %v918_v32, 0.0  ;;  %v920_v52 = vadd.f32 %v919_v26, %v877_v38  ;;  %v1029_v2 = vmul.f32 %v1017_v51, %v1006_v50  ;;  %v2605_v32 = vld [vmem:[%s3393_s5 + $0x230] ss:$12 sps:$4 sm:$0xff]   ;;  %v2606_v38 = vld [vmem:[%s3393_s5 + $0x158] ss:$12 sps:$4 sm:$0xff]  }
 0x19d   :  { %v2618_v50 = vld [vmem:[%s3393_s5 + $0x110] ss:$12 sps:$4 sm:$0xff]  }
 0x19e   :  { %v922_v47 = vadd.f32 %v921_v31, %v879_v35  ;;  %v1030_v58 = vmul.f32 %v1021_v44, %v1007_v43  ;;  %v1009_v3 = vmax.f32 %v920_v52, 0.0  ;;  %v2604_v31 = vld [vmem:[%s3393_s5 + $0xb0] ss:$12 sps:$4 sm:$0xff]   ;;  %v2611_v43 = vld [vmem:[%s3393_s5 + $0x2c0] ss:$12 sps:$4 sm:$0xff]  }
 0x19f   :  { %v2620_v52 = vld [vmem:[%s3393_s5 + $0x50] ss:$12 sps:$4 sm:$0xff]  }
 0x1a0   :  { %v1010_v61 = vmax.f32 %v922_v47, 0.0  ;;  %v1035_v11 = vadd.f32 %v1030_v58, %v1029_v2  ;;  %v1032_v16 = vmul.f32 %v1017_v51, %v1009_v3  ;;  %v2615_v47 = vld [vmem:[%s3393_s5 + $0x2a8] ss:$12 sps:$4 sm:$0xff]   ;;  %v2619_v51 = vld [vmem:[%s3393_s5 + $0x290] ss:$12 sps:$4 sm:$0xff]  }
 0x1a1   :  { %v2626_v58 = vld [vmem:[%s3393_s5 + $0xe0] ss:$12 sps:$4 sm:$0xff]   ;;  %v2633_v2 = vld [vmem:[%s3393_s5 + $0x188] ss:$12 sps:$4 sm:$0xff]  }
 0x1a2   :  { %v1033_v13 = vmul.f32 %v1021_v44, %v1010_v61  ;;  %v2612_v44 = vld [vmem:[%s3393_s5 + $0x80] ss:$12 sps:$4 sm:$0xff]  }
 0x1a3   :  { %v2629_v61 = vld [vmem:[%s3393_s5 + $0x1a0] ss:$12 sps:$4 sm:$0xff]  }
 0x1a4   :  { %v3357_v3 = vld [vmem:[%s3396_s9] ss:$0 sm:$0xff] }
 0x1b5   :  { %v2291_v33 = vpop.f32.mrf.mxu0  ;;  %v2313_v34 = vpop.f32.mrf.mxu1 }
 0x1b7   :  { %v2292_v39 = vpop.f32.mrf.mxu0  ;;  %v2314_v40 = vpop.f32.mrf.mxu1 }
 0x1b8   :  { %v2293_v42 = vadd.f32 %v2292_v39, %v2291_v33  ;;  %v2315_v49 = vadd.f32 %v2314_v40, %v2313_v34  ;;  %v1041_v33 = vadd.f32 %v1033_v13, %v1032_v16  ;;  %v2607_v39 = vld [vmem:[%s3393_s5 + $0x2d8] ss:$12 sps:$4 sm:$0xff]  }
 0x1b9   :  { %v2294_v45 = vpop.f32.mrf.mxu0  ;;  %v2316_v46 = vpop.f32.mrf.mxu1  ;;  %v2608_v40 = vld [vmem:[%s3393_s5 + $0x98] ss:$12 sps:$4 sm:$0xff]  }
 0x1ba   :  { %v959_v48 = vadd.f32 %v2293_v42, %v322_v36  ;;  %v2610_v42 = vld [vmem:[%s3393_s5 + $0x140] ss:$12 sps:$4 sm:$0xff]  }
 0x1bb   :  { %v2295_v53 = vpop.f32.mrf.mxu0  ;;  %v2317_v54 = vpop.f32.mrf.mxu1 }
 0x1bc   :  { %v1000_v55 = vadd.f32 %v2315_v49, %v959_v48  ;;  %v2296_v56 = vadd.f32 %v2295_v53, %v2294_v45  ;;  %v2318_v0 = vadd.f32 %v2317_v54, %v2316_v46  ;;  %v2613_v45 = vld [vmem:[%s3393_s5 + $0x200] ss:$12 sps:$4 sm:$0xff]   ;;  %v2614_v46 = vld [vmem:[%s3393_s5 + $0x128] ss:$12 sps:$4 sm:$0xff]   ;;  %v2621_v53 = vld [vmem:[%s3393_s5 + $0x1d0] ss:$12 sps:$4 sm:$0xff]  }
 0x1bd   :  { %v1112_v59 = vpop.f32.mrf.mxu0  ;;  %v1155_v60 = vpop.f32.mrf.mxu1  ;;  %v2616_v48 = vld [vmem:[%s3393_s5 + $0x68] ss:$12 sps:$4 sm:$0xff]   ;;  %v2622_v54 = vld [vmem:[%s3393_s5 + $0xf8] ss:$12 sps:$4 sm:$0xff]  }
 0x1be   :  { %v1008_v62 = vmax.f32 %v1000_v55, 0.0  ;;  %v962_v63 = vadd.f32 %v2296_v56, %v322_v36  ;;  %v1164_v25 = vmax.f32 %v1112_v59, 0.0  ;;  %v1166_v26 = vmax.f32 %v1155_v60, 0.0  ;;  %v2617_v49 = vld [vmem:[%s3393_s5 + $0x1e8] ss:$12 sps:$4 sm:$0xff]  }
 0x1bf   :  { %v1114_v5 = vpop.f32.mrf.mxu0  ;;  %v1157_v6 = vpop.f32.mrf.mxu1  ;;  %v2623_v55 = vld [vmem:[%s3393_s5 + $0x278] ss:$12 sps:$4 sm:$0xff]   ;;  %v2627_v59 = vld [vmem:[%s3393_s5 + $0x260] ss:$12 sps:$4 sm:$0xff]  }
 0x1c0   :  { %v1003_v7 = vadd.f32 %v2318_v0, %v962_v63  ;;  %v1031_v8 = vmul.f32 %v1025_v57, %v1008_v62  ;;  %v1165_v12 = vmax.f32 %v1114_v5, 0.0  ;;  %v1167_v22 = vmax.f32 %v1157_v6, 0.0  ;;  %v2624_v56 = vld [vmem:[%s3393_s5 + $0x38] ss:$12 sps:$4 sm:$0xff]   ;;  %v2628_v60 = vld [vmem:[%s3393_s5 + $0x20] ss:$12 sps:$4 sm:$0xff]  }
 0x1c1   :  { %v1116_v9 = vpop.f32.mrf.mxu0  ;;  %v1159_v10 = vpop.f32.mrf.mxu1  ;;  %v2630_v62 = vld [vmem:[%s3393_s5 + $0xc8] ss:$12 sps:$4 sm:$0xff]  }
 0x1c2   :  { %v1011_v14 = vmax.f32 %v1003_v7, 0.0  ;;  %v1037_v15 = vsel %vm1036_vm3, %v1031_v8, 0.0  ;;  %v1168_v4 = vmax.f32 %v1116_v9, 0.0  ;;  %v1170_v17 = vmax.f32 %v1159_v10, 0.0  ;;  %v2631_v63 = vld [vmem:[%s3393_s5 + $0x248] ss:$12 sps:$4 sm:$0xff]  }
 0x1c3   :  { %v1118_v18 = vpop.f32.mrf.mxu0  ;;  %v1161_v19 = vpop.f32.mrf.mxu1  ;;  %v1038_v21 = vadd.f32 %v1037_v15, %v1035_v11  ;;  %v2632_v0 = vld [vmem:[%s3393_s5 + $0x8] ss:$12 sps:$4 sm:$0xff]  }
 0x1c4   :  { %v1169_v23 = vmax.f32 %v1118_v18, 0.0  ;;  %v1171_v24 = vmax.f32 %v1161_v19, 0.0  ;;  %v1034_v27 = vmul.f32 %v1025_v57, %v1011_v14  ;;  %v3261_v34 = vpack.c.bf16 %v1168_v4, %v1164_v25  ;;  %v2625_v57 = vld [vmem:[%s3393_s5 + $0x1b8] ss:$12 sps:$4 sm:$0xff]   ;;  %v1304_v14 = vld [vmem:[%s3398_s6] sm:$0x7] }
 0x1c5   :  { %1039 = vadd.xlane.f32.xlu0 %v1038_v21  ;;  %v3263_v35 = vpack.c.bf16 %v1170_v17, %v1166_v26  ;;  %v1313_v15 = vrot.slane %v1304_v14, %v3236_v1  ;;  %v1309_v4 = vrot.slane %v1304_v14, %v3238_v20  ;;  %v1317_v26 = vrot.slane %v1304_v14, %v3245_v28 }
 0x1c6   :  { %v1173_v29 = vpack.c.bf16 %v1169_v23, %v1165_v12  ;;  %v1175_v30 = vpack.c.bf16 %v1171_v24, %v1167_v22  ;;  %v1042_v36 = vsel %vm1036_vm3, %v1034_v27, 0.0 }
 0x1c7   :  { %v1043_v37 = vadd.f32 %v1042_v36, %v1041_v33 }
 0x1c8   :  { %1865 = vmatprep.mubr.bf16.mxu0 %v1173_v29  ;;  %1908 = vmatprep.mubr.bf16.mxu1 %v1175_v30 }
 0x1c9   :  { %1866 = vmatmul.mubr.bf16.vlgmr.msra.gmra.mxu0 %v3261_v34  ;;  %1909 = vmatmul.mubr.bf16.vlgmr.msra.gmra.mxu1 %v3263_v35 }
 0x1ca   :  { %2320 = vmatpush3.bf16.msra.mxu0 %v2604_v31  ;;  %2342 = vmatpush3.bf16.msra.mxu1 %v2605_v32  ;;  %v2007_v32 = vld [vmem:[%s3399_s8] sm:$0x7] }
 0x1cb   :  { %1044 = vadd.xlane.f32.xlu0 %v1043_v37  ;;  %1951 = vmatprep.mubr.bf16.mxu0 %v1173_v29 }
 0x1cc   :  { %1992 = vmatprep.mubr.bf16.mxu1 %v1175_v30  ;;  %2321 = vmatprep.subr.bf16.mxu0 %v2606_v38 }
 0x1cd   :  { %2343 = vmatprep.subr.bf16.mxu1 %v2607_v39 }
 0x1ce   :  { %2322 = vmatpush3.bf16.msra.mxu0 %v2608_v40  ;;  %2344 = vmatpush3.bf16.msra.mxu1 %v2609_v41 }
 0x1cf   :  { %2323 = vmatprep.subr.bf16.mxu0 %v2610_v42  ;;  %2345 = vmatprep.subr.bf16.mxu1 %v2611_v43  ;;  %v2012_v42 = vrot.slane %v2007_v32, %v3238_v20 }
 0x1d2   :  { %2324 = vmatpush3.bf16.msra.mxu0 %v2612_v44  ;;  %2346 = vmatpush3.bf16.msra.mxu1 %v2613_v45 }
 0x1d3   :  { %2325 = vmatprep.subr.bf16.mxu0 %v2614_v46  ;;  %2347 = vmatprep.subr.bf16.mxu1 %v2615_v47 }
 0x1d6   :  { %2326 = vmatpush3.bf16.msra.mxu0 %v2616_v48  ;;  %2348 = vmatpush3.bf16.msra.mxu1 %v2617_v49  ;;  %v2020_v48 = vrot.slane %v2007_v32, %v3245_v28 }
 0x1d7   :  { %2327 = vmatprep.subr.bf16.mxu0 %v2618_v50  ;;  %2349 = vmatprep.subr.bf16.mxu1 %v2619_v51 }
 0x1da   :  { %2328 = vmatpush3.bf16.msra.mxu0 %v2620_v52  ;;  %2350 = vmatpush3.bf16.msra.mxu1 %v2621_v53 }
 0x1db   :  { %2329 = vmatprep.subr.bf16.mxu0 %v2622_v54  ;;  %2351 = vmatprep.subr.bf16.mxu1 %v2623_v55 }
 0x1de   :  { %2330 = vmatpush3.bf16.msra.mxu0 %v2624_v56  ;;  %2352 = vmatpush3.bf16.msra.mxu1 %v2625_v57 }
 0x1df   :  { %2331 = vmatprep.subr.bf16.mxu0 %v2626_v58  ;;  %2353 = vmatprep.subr.bf16.mxu1 %v2627_v59 }
 0x1e2   :  { %2332 = vmatpush3.bf16.msra.mxu0 %v2628_v60  ;;  %2354 = vmatpush3.bf16.msra.mxu1 %v2629_v61 }
 0x1e3   :  { %2333 = vmatprep.subr.bf16.mxu0 %v2630_v62  ;;  %2355 = vmatprep.subr.bf16.mxu1 %v2631_v63 }
 0x1e6   :  { %2334 = vmatpush3.bf16.msra.mxu0 %v2632_v0  ;;  %2356 = vmatpush3.bf16.msra.mxu1 %v2633_v2 }
 0x1e9   :  { %1952 = vmatmul.mubr.bf16.vlgmr.msra.gmra.mxu0 %v3261_v34  ;;  %1993 = vmatmul.mubr.bf16.vlgmr.msra.gmra.mxu1 %v3263_v35  ;;  %v2016_v35 = vrot.slane %v2007_v32, %v3236_v1 }
 0x24e   :  { %v1040_v5 = vpop.xlane.xlu0 %1039 }
 0x24f   :  { %v2047_v6 = vadd.f32 %v3357_v3, %v1040_v5 }
 0x251   :  { %2050 = vst.msk [vmem:[%s3397_s10] sm:$0xff] %vm2049_vm4, %v2047_v6 }
 0x254   :  { %v1045_v7 = vpop.xlane.xlu0 %1044 }
 0x255   :  { %v2048_v8 = vadd.f32 %v3357_v3, %v1045_v7 }
 0x257   :  { %2051 = vst.msk [vmem:[%s3397_s10 + $0x8] sm:$0xff] %vm2049_vm4, %v2048_v8 }
 0x289   :  { %v1867_v9 = vpop.f32.mrf.mxu0  ;;  %v1910_v10 = vpop.f32.mrf.mxu1 }
 0x28a   :  { %v1868_v21 = vadd.f32 %v1867_v9, %v1309_v4 }
 0x28b   :  { %v1869_v11 = vpop.f32.mrf.mxu0  ;;  %v1912_v13 = vpop.f32.mrf.mxu1 }
 0x28c   :  { %v1870_v18 = vadd.f32 %v1869_v11, %v1313_v15  ;;  %v1911_v27 = vadd.f32 %v1910_v10, %v1868_v21 }
 0x28d   :  { %v1871_v16 = vpop.f32.mrf.mxu0  ;;  %v1914_v17 = vpop.f32.mrf.mxu1 }
 0x28e   :  { %v1913_v22 = vadd.f32 %v1912_v13, %v1870_v18  ;;  %v1872_v29 = vadd.f32 %v1871_v16, %v1309_v4  ;;  %v2001_v41 = vmax.f32 %v1911_v27, 0.0 }
 0x28f   :  { %v1873_v19 = vpop.f32.mrf.mxu0  ;;  %v1916_v12 = vpop.f32.mrf.mxu1 }
 0x290   :  { %v1874_v23 = vadd.f32 %v1873_v19, %v1313_v15  ;;  %v2002_v34 = vmax.f32 %v1913_v22, 0.0  ;;  %v1915_v43 = vadd.f32 %v1914_v17, %v1872_v29  ;;  %v2024_v53 = vmul.f32 %v2012_v42, %v2001_v41 }
 0x292   :  { %v1917_v36 = vadd.f32 %v1916_v12, %v1874_v23  ;;  %v2025_v49 = vmul.f32 %v2016_v35, %v2002_v34  ;;  %v2004_v54 = vmax.f32 %v1915_v43, 0.0 }
 0x294   :  { %v2005_v50 = vmax.f32 %v1917_v36, 0.0  ;;  %v2030_v58 = vadd.f32 %v2025_v49, %v2024_v53  ;;  %v2027_v60 = vmul.f32 %v2012_v42, %v2004_v54 }
 0x296   :  { %v2028_v57 = vmul.f32 %v2016_v35, %v2005_v50 }
 0x298   :  { %v2035_v63 = vadd.f32 %v2028_v57, %v2027_v60 }
 0x2a9   :  { %v2335_v24 = vpop.f32.mrf.mxu0  ;;  %v2357_v25 = vpop.f32.mrf.mxu1 }
 0x2ab   :  { %v2336_v30 = vpop.f32.mrf.mxu0  ;;  %v2358_v31 = vpop.f32.mrf.mxu1 }
 0x2ac   :  { %v2337_v33 = vadd.f32 %v2336_v30, %v2335_v24  ;;  %v2359_v40 = vadd.f32 %v2358_v31, %v2357_v25 }
 0x2ad   :  { %v2338_v37 = vpop.f32.mrf.mxu0  ;;  %v2360_v38 = vpop.f32.mrf.mxu1 }
 0x2ae   :  { %v1954_v39 = vadd.f32 %v2337_v33, %v1317_v26 }
 0x2af   :  { %v2339_v44 = vpop.f32.mrf.mxu0  ;;  %v2361_v45 = vpop.f32.mrf.mxu1 }
 0x2b0   :  { %v1995_v46 = vadd.f32 %v2359_v40, %v1954_v39  ;;  %v2340_v47 = vadd.f32 %v2339_v44, %v2338_v37  ;;  %v2362_v1 = vadd.f32 %v2361_v45, %v2360_v38 }
 0x2b2   :  { %v2003_v51 = vmax.f32 %v1995_v46, 0.0  ;;  %v1957_v52 = vadd.f32 %v2340_v47, %v1317_v26 }
 0x2b4   :  { %v1998_v55 = vadd.f32 %v2362_v1, %v1957_v52  ;;  %v2026_v56 = vmul.f32 %v2020_v48, %v2003_v51 }
 0x2b6   :  { %v2006_v59 = vmax.f32 %v1998_v55, 0.0  ;;  %v2031_v20 = vsel %vm1036_vm3, %v2026_v56, 0.0 }
 0x2b7   :  { %v2032_v61 = vadd.f32 %v2031_v20, %v2030_v58 }
 0x2b8   :  { %v2029_v62 = vmul.f32 %v2020_v48, %v2006_v59 }
 0x2b9   :  { %2033 = vadd.xlane.f32.xlu1 %v2032_v61 }
 0x2ba   :  { %v2036_v28 = vsel %vm1036_vm3, %v2029_v62, 0.0 }
 0x2bb   :  { %v2037_v0 = vadd.f32 %v2036_v28, %v2035_v63 }
 0x2bd   :  { %2038 = vadd.xlane.f32.xlu1 %v2037_v0 }
 0x342   :  { %v2034_v2 = vpop.xlane.xlu1 %2033 }
 0x343   :  { %v2059_v5 = vadd.f32 %v3357_v3, %v2034_v2 }
 0x345   :  { %2062 = vst.msk [vmem:[%s3397_s10] sm:$0xff] %vm2061_vm5, %v2059_v5 }
 0x346   :  { %v2039_v6 = vpop.xlane.xlu1 %2038 }
 0x347   :  { %v2060_v7 = vadd.f32 %v3357_v3, %v2039_v6 }
 0x349   :  { %2063 = vst.msk [vmem:[%s3397_s10 + $0x8] sm:$0xff] %vm2061_vm5, %v2060_v7 }

</bundles_post_ra>
